<compile_context>
chip_gen: v7x
topology: tpu7x:2x2x1
jax: 0.10.0
libtpu: 0.0.40
codegen_flags: <defaults>
</compile_context>

<pallas_src>
import functools

import numpy as np
import jax
import jax.numpy as jnp
from jax.experimental import pallas as pl
from jax.experimental.pallas import tpu as pltpu


def _qgen_kernel(noise_ref, w_ref, out_ref, *, n_qubits):
    """noise_ref: (Bp, n_qubits) f32; w_ref: (2**n, L) f32; out_ref: (Bp, L) f32."""
    dim = 2 ** n_qubits

    half = noise_ref[...] * 0.5                       # (Bp, n_qubits)
    nc = jnp.cos(half)                                # EUP
    ns = jnp.sin(half)

    # Closed-form RY(noise) embedding of |0..0>:
    #   state[b, j] = prod_q (cos(noise[b,q]/2) if bit_q(j)==0 else sin(noise[b,q]/2))
    # with wire 0 = MSB (PennyLane).  Masks are compile-time constants (iota + bit test).
    lane = jax.lax.broadcasted_iota(jnp.int32, (1, dim), 1)
    state = None
    for q in range(n_qubits):
        bit = 1 << (n_qubits - 1 - q)
        mask = (lane & bit) > 0                       # (1, dim) constant mask
        f = jnp.where(mask, ns[:, q:q + 1], nc[:, q:q + 1])     # (Bp, dim)
        state = f if state is None else state * f

    # One MXU pass applies all 8 pre-composed patch unitaries at once.
    amps = jnp.dot(state, w_ref[...],
                   preferred_element_type=jnp.float32,
                   precision=jax.lax.Precision.HIGHEST)          # (Bp, L)
    out_ref[...] = amps * amps                        # probabilities, lane-dense store


def _compose_patch_matrix(q_params, n_qubits, q_depth):
    """Compose the batch-independent circuit into W of shape (2**n, 8*2**n) with
    W[j, p*dim + i] = U_p[i, j], so that probs = (noise_state @ W)**2."""
    dim = 2 ** n_qubits
    w = q_params.reshape(8, q_depth, n_qubits).astype(jnp.float32) * 0.5
    c = jnp.cos(w)                                    # (8, D, Q)
    s = jnp.sin(w)

    # Static CZ-chain diagonal (CZ gates are diagonal and commute -> one diag per layer).
    j = np.arange(dim)
    cz_np = np.ones((dim,), np.float32)
    for q in range(n_qubits - 1):
        b0 = 1 << (n_qubits - 1 - q)
        b1 = 1 << (n_qubits - 2 - q)
        cz_np *= np.where(((j & b0) > 0) & ((j & b1) > 0), -1.0, 1.0)
    cz = jnp.asarray(cz_np)

    # U[p] maps input basis index (columns) -> output basis index (rows); wire 0 = MSB.
    U = jnp.broadcast_to(jnp.eye(dim, dtype=jnp.float32), (8, dim, dim))
    for d in range(q_depth):
        for q in range(n_qubits):
            left = 2 ** q
            right = 2 ** (n_qubits - 1 - q)
            Ur = U.reshape(8, left, 2, right, dim)
            cq = c[:, d, q].reshape(8, 1, 1, 1)
            sq = s[:, d, q].reshape(8, 1, 1, 1)
            r0, r1 = Ur[:, :, 0], Ur[:, :, 1]
            # RY = [[c, -s], [s, c]] applied to the output index (left-multiply).
            U = jnp.stack([cq * r0 - sq * r1, sq * r0 + cq * r1],
                          axis=2).reshape(8, dim, dim)
        U = U * cz[None, :, None]                     # CZ chain on output rows
    # (dim_in j, patch p, dim_out i) -> (dim, 8*dim)
    return jnp.transpose(U, (2, 0, 1)).reshape(dim, 8 * dim)


def generator_quantum_forward(noise, q_params, n_qubits, q_depth):
    """noise: (B, n_qubits) f32; q_params: (8, q_depth*n_qubits) f32.
    Returns (B, 8 * 2**n_qubits) f32 (per batch element: 8 patch prob vectors concat)."""
    dim = 2 ** n_qubits
    out_cols = 8 * dim
    B = noise.shape[0]

    W = _compose_patch_matrix(q_params, n_qubits, q_depth)      # (dim, 8*dim)

    # Lane-dense output guard: pad lanes up to 128 (only matters when n_qubits < 4).
    lanes = max(out_cols, 128)
    if lanes != out_cols:
        W = jnp.pad(W, ((0, 0), (0, lanes - out_cols)))

    # Pad batch to a multiple of 8 so every f32 vreg sublane is used.
    Bp = max(8, ((B + 7) // 8) * 8)
    noise_p = jnp.zeros((Bp, n_qubits), jnp.float32).at[:B].set(noise.astype(jnp.float32))

    kernel = functools.partial(_qgen_kernel, n_qubits=n_qubits)
    out = pl.pallas_call(
        kernel,
        out_shape=jax.ShapeDtypeStruct((Bp, lanes), jnp.float32),
        in_specs=[pl.BlockSpec(memory_space=pltpu.MemorySpace.VMEM),
                  pl.BlockSpec(memory_space=pltpu.MemorySpace.VMEM)],
        out_specs=pl.BlockSpec(memory_space=pltpu.MemorySpace.VMEM),
    )(noise_p, W)
    return out[:B, :out_cols]


def _reference_forward(noise, q_params, n_qubits, q_depth):
    """Plain numpy tensor-network reference (independent code path)."""
    dim = 2 ** n_qubits
    noise = np.asarray(noise, np.float64)
    weights = np.asarray(q_params, np.float64).reshape(8, q_depth, n_qubits)
    B = noise.shape[0]
    out = np.zeros((B, 8 * dim), np.float64)

    def ry(state, q, theta):
        c, s = np.cos(theta / 2.0), np.sin(theta / 2.0)
        U = np.array([[c, -s], [s, c]])
        st = np.moveaxis(state, q, 0)
        st = np.tensordot(U, st, axes=([1], [0]))
        return np.moveaxis(st, 0, q)

    for b in range(B):
        for p in range(8):
            state = np.zeros(dim)
            state[0] = 1.0
            state = state.reshape([2] * n_qubits)
            for q in range(n_qubits):
                state = ry(state, q, noise[b, q])
            for d in range(q_depth):
                for q in range(n_qubits):
                    state = ry(state, q, weights[p, d, q])
                for q in range(n_qubits - 1):
                    st = np.moveaxis(state, (q, q + 1), (0, 1))
                    st[1, 1] = -st[1, 1]          # CZ (view write-back)
            out[b, p * dim:(p + 1) * dim] = state.reshape(dim) ** 2
    return out


if __name__ == "__main__":
    n_qubits = 5
    q_depth = 4
    q_delta = 0.1
    batch = 2
    dim = 2 ** n_qubits

    key = jax.random.PRNGKey(0)
    k_noise, k_params = jax.random.split(key)
    # latent noise in [0, pi/2), as in the patch-QGAN setup
    noise = jax.random.uniform(k_noise, (batch, n_qubits), jnp.float32) * (np.pi / 2)
    # nn.ParameterList of 8 tensors, each q_delta * randn(q_depth * n_qubits)
    q_params = q_delta * jax.random.normal(k_params, (8, q_depth * n_qubits), jnp.float32)

    fwd = jax.jit(generator_quantum_forward, static_argnums=(2, 3))
    out = fwd(noise, q_params, n_qubits, q_depth)
    out = jax.block_until_ready(out)

    assert out.shape == (batch, 8 * dim), out.shape

    # probabilities of each 2**n_qubits patch must sum to 1 (unitarity check)
    patch_sums = np.asarray(out).reshape(batch, 8, dim).sum(-1)
    assert np.allclose(patch_sums, 1.0, atol=1e-4), patch_sums

    # compare against independent numpy (float64) reference
    ref = _reference_forward(noise, q_params, n_qubits, q_depth)
    err = np.abs(np.asarray(out) - ref).max()
    assert err < 5e-5, err

    print("KERNEL_OK")
</pallas_src>

<mosaic_0001>
module attributes {stable_mosaic.version = 11 : i64} {
  func.func @_qgen_kernel(%arg0: memref<8x5xf32, #tpu.memory_space<vmem>>, %arg1: memref<32x256xf32, #tpu.memory_space<vmem>>, %arg2: memref<8x256xf32, #tpu.memory_space<vmem>>) attributes {dimension_semantics = [], scalar_prefetch = 0 : i64, scratch_operands = 0 : i64, tpu.core_type = #tpu.core_type<tc>} {
    %c0 = arith.constant 0 : index
    %c0_0 = arith.constant 0 : index
    %0 = vector.load %arg0[%c0, %c0_0] : memref<8x5xf32, #tpu.memory_space<vmem>>, vector<8x5xf32>
    %cst = arith.constant 5.000000e-01 : f32
    %1 = vector.broadcast %cst : f32 to vector<8x5xf32>
    %2 = arith.mulf %0, %1 : vector<8x5xf32>
    %3 = math.cos %2 : vector<8x5xf32>
    %4 = math.sin %2 : vector<8x5xf32>
    %5 = tpu.iota {dimensions = array<i32: 1>} : vector<1x32xi32>
    %c16_i32 = arith.constant 16 : i32
    %6 = vector.broadcast %c16_i32 : i32 to vector<1x32xi32>
    %7 = arith.andi %5, %6 : vector<1x32xi32>
    %c0_i32 = arith.constant 0 : i32
    %8 = vector.broadcast %c0_i32 : i32 to vector<1x32xi32>
    %9 = arith.cmpi sgt, %7, %8 : vector<1x32xi32>
    %10 = vector.extract_strided_slice %4 {offsets = [0, 0], sizes = [8, 1], strides = [1, 1]} : vector<8x5xf32> to vector<8x1xf32>
    %11 = vector.extract_strided_slice %3 {offsets = [0, 0], sizes = [8, 1], strides = [1, 1]} : vector<8x5xf32> to vector<8x1xf32>
    %12 = vector.shape_cast %9 : vector<1x32xi1> to vector<1x32xi1>
    %13 = vector.broadcast %12 : vector<1x32xi1> to vector<8x32xi1>
    %14 = vector.shape_cast %10 : vector<8x1xf32> to vector<8x1xf32>
    %15 = vector.broadcast %14 : vector<8x1xf32> to vector<8x32xf32>
    %16 = vector.shape_cast %11 : vector<8x1xf32> to vector<8x1xf32>
    %17 = vector.broadcast %16 : vector<8x1xf32> to vector<8x32xf32>
    %18 = arith.select %13, %15, %17 : vector<8x32xi1>, vector<8x32xf32>
    %c8_i32 = arith.constant 8 : i32
    %19 = vector.broadcast %c8_i32 : i32 to vector<1x32xi32>
    %20 = arith.andi %5, %19 : vector<1x32xi32>
    %c0_i32_1 = arith.constant 0 : i32
    %21 = vector.broadcast %c0_i32_1 : i32 to vector<1x32xi32>
    %22 = arith.cmpi sgt, %20, %21 : vector<1x32xi32>
    %23 = vector.extract_strided_slice %4 {offsets = [0, 1], sizes = [8, 1], strides = [1, 1]} : vector<8x5xf32> to vector<8x1xf32>
    %24 = vector.extract_strided_slice %3 {offsets = [0, 1], sizes = [8, 1], strides = [1, 1]} : vector<8x5xf32> to vector<8x1xf32>
    %25 = vector.shape_cast %22 : vector<1x32xi1> to vector<1x32xi1>
    %26 = vector.broadcast %25 : vector<1x32xi1> to vector<8x32xi1>
    %27 = vector.shape_cast %23 : vector<8x1xf32> to vector<8x1xf32>
    %28 = vector.broadcast %27 : vector<8x1xf32> to vector<8x32xf32>
    %29 = vector.shape_cast %24 : vector<8x1xf32> to vector<8x1xf32>
    %30 = vector.broadcast %29 : vector<8x1xf32> to vector<8x32xf32>
    %31 = arith.select %26, %28, %30 : vector<8x32xi1>, vector<8x32xf32>
    %32 = arith.mulf %18, %31 : vector<8x32xf32>
    %c4_i32 = arith.constant 4 : i32
    %33 = vector.broadcast %c4_i32 : i32 to vector<1x32xi32>
    %34 = arith.andi %5, %33 : vector<1x32xi32>
    %c0_i32_2 = arith.constant 0 : i32
    %35 = vector.broadcast %c0_i32_2 : i32 to vector<1x32xi32>
    %36 = arith.cmpi sgt, %34, %35 : vector<1x32xi32>
    %37 = vector.extract_strided_slice %4 {offsets = [0, 2], sizes = [8, 1], strides = [1, 1]} : vector<8x5xf32> to vector<8x1xf32>
    %38 = vector.extract_strided_slice %3 {offsets = [0, 2], sizes = [8, 1], strides = [1, 1]} : vector<8x5xf32> to vector<8x1xf32>
    %39 = vector.shape_cast %36 : vector<1x32xi1> to vector<1x32xi1>
    %40 = vector.broadcast %39 : vector<1x32xi1> to vector<8x32xi1>
    %41 = vector.shape_cast %37 : vector<8x1xf32> to vector<8x1xf32>
    %42 = vector.broadcast %41 : vector<8x1xf32> to vector<8x32xf32>
    %43 = vector.shape_cast %38 : vector<8x1xf32> to vector<8x1xf32>
    %44 = vector.broadcast %43 : vector<8x1xf32> to vector<8x32xf32>
    %45 = arith.select %40, %42, %44 : vector<8x32xi1>, vector<8x32xf32>
    %46 = arith.mulf %32, %45 : vector<8x32xf32>
    %c2_i32 = arith.constant 2 : i32
    %47 = vector.broadcast %c2_i32 : i32 to vector<1x32xi32>
    %48 = arith.andi %5, %47 : vector<1x32xi32>
    %c0_i32_3 = arith.constant 0 : i32
    %49 = vector.broadcast %c0_i32_3 : i32 to vector<1x32xi32>
    %50 = arith.cmpi sgt, %48, %49 : vector<1x32xi32>
    %51 = vector.extract_strided_slice %4 {offsets = [0, 3], sizes = [8, 1], strides = [1, 1]} : vector<8x5xf32> to vector<8x1xf32>
    %52 = vector.extract_strided_slice %3 {offsets = [0, 3], sizes = [8, 1], strides = [1, 1]} : vector<8x5xf32> to vector<8x1xf32>
    %53 = vector.shape_cast %50 : vector<1x32xi1> to vector<1x32xi1>
    %54 = vector.broadcast %53 : vector<1x32xi1> to vector<8x32xi1>
    %55 = vector.shape_cast %51 : vector<8x1xf32> to vector<8x1xf32>
    %56 = vector.broadcast %55 : vector<8x1xf32> to vector<8x32xf32>
    %57 = vector.shape_cast %52 : vector<8x1xf32> to vector<8x1xf32>
    %58 = vector.broadcast %57 : vector<8x1xf32> to vector<8x32xf32>
    %59 = arith.select %54, %56, %58 : vector<8x32xi1>, vector<8x32xf32>
    %60 = arith.mulf %46, %59 : vector<8x32xf32>
    %c1_i32 = arith.constant 1 : i32
    %61 = vector.broadcast %c1_i32 : i32 to vector<1x32xi32>
    %62 = arith.andi %5, %61 : vector<1x32xi32>
    %c0_i32_4 = arith.constant 0 : i32
    %63 = vector.broadcast %c0_i32_4 : i32 to vector<1x32xi32>
    %64 = arith.cmpi sgt, %62, %63 : vector<1x32xi32>
    %65 = vector.extract_strided_slice %4 {offsets = [0, 4], sizes = [8, 1], strides = [1, 1]} : vector<8x5xf32> to vector<8x1xf32>
    %66 = vector.extract_strided_slice %3 {offsets = [0, 4], sizes = [8, 1], strides = [1, 1]} : vector<8x5xf32> to vector<8x1xf32>
    %67 = vector.shape_cast %64 : vector<1x32xi1> to vector<1x32xi1>
    %68 = vector.broadcast %67 : vector<1x32xi1> to vector<8x32xi1>
    %69 = vector.shape_cast %65 : vector<8x1xf32> to vector<8x1xf32>
    %70 = vector.broadcast %69 : vector<8x1xf32> to vector<8x32xf32>
    %71 = vector.shape_cast %66 : vector<8x1xf32> to vector<8x1xf32>
    %72 = vector.broadcast %71 : vector<8x1xf32> to vector<8x32xf32>
    %73 = arith.select %68, %70, %72 : vector<8x32xi1>, vector<8x32xf32>
    %74 = arith.mulf %60, %73 : vector<8x32xf32>
    %c0_5 = arith.constant 0 : index
    %c0_6 = arith.constant 0 : index
    %75 = vector.load %arg1[%c0_5, %c0_6] : memref<32x256xf32, #tpu.memory_space<vmem>>, vector<32x256xf32>
    %cst_7 = arith.constant dense<0.000000e+00> : vector<8x256xf32>
    %76 = tpu.matmul %74, %75, %cst_7 {dimension_numbers = #tpu.dot_dimension_numbers<[1], [0], [0], [1], [0, 0, 1, 1], [], []>, precision = #tpu.contract_precision<fp32>} : vector<8x32xf32>, vector<32x256xf32>, vector<8x256xf32> -> vector<8x256xf32>
    %77 = arith.mulf %76, %76 : vector<8x256xf32>
    %c0_8 = arith.constant 0 : index
    %c0_9 = arith.constant 0 : index
    %78 = vector.load %arg2[%c0_8, %c0_9] : memref<8x256xf32, #tpu.memory_space<vmem>>, vector<8x256xf32>
    tpu.vector_store %arg2[%c0_8, %c0_9], %77 {strides = array<i32>} : memref<8x256xf32, #tpu.memory_space<vmem>>, vector<8x256xf32>,
    return
  }
}

</mosaic_0001>

<bundles_post_ra>
// kernel: generator_quantum_forward.1
= control target key start
LH: loop header
LB: loop body
LE: loop exit
PB: predicated region body
PF: predicated region fallthrough
CT: control target
= control target key end

     0   :  { %v950_v0 = vmov 1   ;;  %v951_v1 = vmov 0   ;;  %v952_v15 = vmov 683565275   ;;  %v953_v17 = vmov 2475754826   ;;  %s1100_s0 = inlined_call_operand.vmem [shape: f32[8,5], index: 0, kind: input, shape index: {}]   ;;  %s1101_s1 = inlined_call_operand.vmem [shape: f32[32,256], index: 1, kind: input, shape index: {}]   ;;  %s1102_s2 = inlined_call_operand.vmem [shape: f32[8,256], index: 2, kind: output, shape index: {}]  }
   0x1   :  { %939 = vset.pattern.permute.xlu1 %v950_v0  ;;  %938 = vset.pattern.permute.xlu0 %v951_v1  ;;  %v11_v2 = vld [vmem:[%s1100_s0] sm:$0xff]  ;;  %v954_v19 = vmov 2131351028   ;;  %v955_v21 = vmov 2102212464  }
   0x2   :  { %v980_v3 = vmul.f32 0.5, %v11_v2  ;;  %v956_v23 = vmov 920167782   ;;  %v957_v30 = vmov 1326507024  }
   0x4   :  { %v16_v4 = vand.u32 2139095040, %v980_v3  ;;  %v13_v6 = vand.u32 2147483647, %v980_v3  ;;  %vm15_vm7 = vcmp.lt.s32.totalorder %v980_v3, 0  ;;  %vm105_vm15 = vweird.f32 %v980_v3 }
   0x6   :  { %v17_v5 = vshrl.u32 %v16_v4, 23  ;;  %v20_v9 = vand.u32 8388607, %v13_v6  ;;  %vm14_vm8 = vcmp.le.f32.partialorder %v13_v6, 0.7853982 }
   0x8   :  { %v856_v7 = vadd.s32 4294967169, %v17_v5  ;;  %v21_v12 = vor.u32 8388608, %v20_v9 }
   0xa   :  { %v23_v8 = vadd.s32 1, %v856_v7  ;;  %v61_v32 = vshll.u32 %v21_v12, 8 }
   0xc   :  { %vm24_vm0 = vcmp.gt.s32.totalorder %v23_v8, 0 }
   0xd   :  { %v25_v10 = vsel %vm24_vm0, %v23_v8, 0 }
   0xe   :  { %v27_v11 = vand.u32 31, %v25_v10  ;;  %v26_v13 = vshrl.u32 %v25_v10, 5 }
  0x10   :  { %v28_v14 = vsub.s32 32, %v27_v11  ;;  %v30_v16 = vshll.u32 %v952_v15, %v27_v11  ;;  %v33_v18 = vshll.u32 %v953_v17, %v27_v11  ;;  %v36_v20 = vshll.u32 %v954_v19, %v27_v11 }
  0x11   :  { %v39_v22 = vshll.u32 %v955_v21, %v27_v11  ;;  %v42_v24 = vshll.u32 %v956_v23, %v27_v11  ;;  %vm45_vm1 = vcmp.lt.s32.totalorder %v26_v13, 1  ;;  %vm48_vm2 = vcmp.lt.s32.totalorder %v26_v13, 4 }
  0x12   :  { %v29_v25 = vshrl.u32 %v952_v15, %v28_v14  ;;  %v31_v26 = vshrl.u32 %v953_v17, %v28_v14  ;;  %v34_v27 = vshrl.u32 %v954_v19, %v28_v14  ;;  %v37_v28 = vshrl.u32 %v955_v21, %v28_v14 }
  0x13   :  { %v40_v29 = vshrl.u32 %v956_v23, %v28_v14  ;;  %v43_v31 = vshrl.u32 %v957_v30, %v28_v14  ;;  %vm46_vm3 = vcmp.lt.s32.totalorder %v26_v13, 2  ;;  %vm47_vm4 = vcmp.lt.s32.totalorder %v26_v13, 3 }
  0x14   :  { %v32_v33 = vor.u32 %v31_v26, %v30_v16  ;;  %v35_v34 = vor.u32 %v34_v27, %v33_v18  ;;  %v38_v35 = vor.u32 %v37_v28, %v36_v20 }
  0x15   :  { %v41_v36 = vor.u32 %v40_v29, %v39_v22  ;;  %v44_v37 = vor.u32 %v43_v31, %v42_v24 }
  0x16   :  { %v49_v38 = vsel %vm45_vm1, %v29_v25, %v32_v33  ;;  %v50_v39 = vsel %vm48_vm2, %v38_v35, 2102212464  ;;  %v53_v40 = vsel %vm45_vm1, %v32_v33, %v35_v34  ;;  %v57_v41 = vsel %vm45_vm1, %v35_v34, %v38_v35 }
  0x17   :  { %v51_v42 = vsel %vm47_vm4, %v35_v34, %v50_v39  ;;  %v54_v43 = vsel %vm48_vm2, %v41_v36, 920167782  ;;  %v58_v44 = vsel %vm48_vm2, %v44_v37, 1326507024  ;;  %v958_v37 = vmov 2   ;;  %v294_v39 = vld [vmem:[%s1101_s1 + $0x8] sm:$0xff] }
  0x18   :  { %v55_v45 = vsel %vm47_vm4, %v38_v35, %v54_v43  ;;  %v59_v46 = vsel %vm47_vm4, %v41_v36, %v58_v44  ;;  %v52_v47 = vsel %vm46_vm3, %v49_v38, %v51_v42  ;;  %v959_v38 = vmov 3   ;;  %v293_v43 = vld [vmem:[%s1101_s1] sm:$0xff]  ;;  %v295_v44 = vld [vmem:[%s1101_s1 + $0x10] sm:$0xff] }
  0x19   :  { %v56_v48 = vsel %vm46_vm3, %v53_v40, %v55_v45  ;;  %v60_v49 = vsel %vm46_vm3, %v57_v41, %v59_v46  ;;  %v68_v54 = vmul.u32 %v61_v32, %v52_v47  ;;  %v296_v40 = vld [vmem:[%s1101_s1 + $0x18] sm:$0xff]  ;;  %v305_v41 = vand.u32 4294901760, %v294_v39 }
  0x1a   :  { %v986_v50 = vmul.u32.u64.low %v61_v32, %v60_v49  ;;  %v987_v51 = vmul.u32.u64.high %v61_v32, %v60_v49, %v986_v50  ;;  %v989_v52 = vmul.u32.u64.low %v61_v32, %v56_v48  ;;  %v990_v53 = vmul.u32.u64.high %v61_v32, %v56_v48, %v989_v52  ;;  %v298_v49 = vld [vmem:[%s1101_s1 + $0x28] sm:$0xff] }
  0x1b   :  { %v309_v42 = vand.u32 4294901760, %v296_v40  ;;  %v307_v45 = vand.u32 4294901760, %v293_v43  ;;  %v311_v46 = vand.u32 4294901760, %v295_v44  ;;  %v300_v50 = vld [vmem:[%s1101_s1 + $0x38] sm:$0xff] }
  0x1c   :  { %vm70_vm5 = vc.u32 %v987_v51, %v989_v52  ;;  %v71_v55 = vadd.s32 1, %v990_v53  ;;  %v69_v2 = vadd.s32 %v989_v52, %v987_v51  ;;  %v313_v51 = vand.u32 4294901760, %v298_v49 }
  0x1d   :  { %v1013_v47 = vpack.c.bf16 %v309_v42, %v305_v41  ;;  %v1015_v48 = vpack.c.bf16 %v311_v46, %v307_v45  ;;  %v317_v52 = vand.u32 4294901760, %v300_v50 }
  0x1e   :  { %v72_v56 = vsel %vm70_vm5, %v71_v55, %v990_v53  ;;  %v297_v53 = vld [vmem:[%s1101_s1 + $0x20] sm:$0xff]  ;;  %vm301_vm5 = vcmask 261120  }
  0x1f   :  { %v73_v57 = vadd.s32 %v72_v56, %v68_v54  ;;  %889 = vmatprep.subr.bf16.mxu0 %v1013_v47  ;;  %865 = vmatprep.subr.bf16.mxu1 %v1013_v47  ;;  %v299_v54 = vld [vmem:[%s1101_s1 + $0x30] sm:$0xff]  ;;  %v315_v55 = vand.u32 4294901760, %v297_v53 }
  0x20   :  { %891 = vmatpush1.bf16.msra.mxu0 %v1015_v48  ;;  %867 = vmatpush1.bf16.msra.mxu1 %v1015_v48  ;;  %v319_v56 = vand.u32 4294901760, %v299_v54 }
  0x21   :  { %v74_v58 = vadd.s32 536870912, %v73_v57 }
  0x23   :  { %v75_v59 = vshrl.u32 %v74_v58, 30  ;;  %v1035_v58 = vsub.f32 %v296_v40, %v309_v42  ;;  %v220_v42 = vlaneseq }
  0x25   :  { %v76_v60 = vshll.u32 %v75_v59, 30  ;;  %v99_v16 = vsub.s32 4, %v75_v59 }
  0x27   :  { %v77_v61 = vsub.s32 %v73_v57, %v76_v60  ;;  %v100_v19 = vsel %vm15_vm7, %v99_v16, %v75_v59  ;;  %v1033_v57 = vsub.f32 %v294_v39, %v305_v41  ;;  %v1037_v59 = vpack.c.bf16 %v317_v52, %v313_v51 }
  0x28   :  { %v102_v22 = vsel %vm14_vm8, 0, %v100_v19  ;;  %v1039_v60 = vsub.f32 %v293_v43, %v307_v45 }
  0x29   :  { %v79_v62 = vsub.s32 0, %v77_v61  ;;  %v209_v23 = vadd.s32 3, %v102_v22  ;;  %v106_v25 = vand.u32 3, %v102_v22  ;;  %893 = vmatprep.subr.bf16.mxu0 %v1037_v59  ;;  %869 = vmatprep.subr.bf16.mxu1 %v1037_v59 }
  0x2b   :  { %v857_v63 = vmin.u32 %v79_v62, %v77_v61  ;;  %v210_v24 = vand.u32 3, %v209_v23  ;;  %vm111_vm10 = vcmp.eq.s32.totalorder %v106_v25, 2  ;;  %vm108_vm12 = vcmp.eq.s32.totalorder %v106_v25, 0 }
  0x2c   :  { %vm107_vm14 = vcmp.lt.s32.totalorder %v106_v25, 2  ;;  %v1043_v62 = vpack.c.bf16 %v319_v56, %v315_v55 }
  0x2d   :  { %v81_v0 = vclz %v857_v63  ;;  %vm215_vm9 = vcmp.eq.s32.totalorder %v210_v24, 2  ;;  %vm212_vm11 = vcmp.eq.s32.totalorder %v210_v24, 0  ;;  %vm211_vm13 = vcmp.lt.s32.totalorder %v210_v24, 2 }
  0x2e   :  { %v1045_v63 = vsub.f32 %v298_v49, %v313_v51  ;;  %895 = vmatpush1.bf16.msra.mxu0 %v1043_v62  ;;  %871 = vmatpush1.bf16.msra.mxu1 %v1043_v62 }
  0x2f   :  { %v858_v1 = vadd.s32 4294967294, %v81_v0  ;;  %v1047_v0 = vsub.f32 %v300_v50, %v317_v52 }
  0x30   :  { %v415_v16 = vand.u32 4294901760, %v1045_v63 }
  0x31   :  { %vm859_vm6 = vcmp.lt.s32.totalorder %v858_v1, 0 }
  0x32   :  { %v84_v4 = vsel %vm859_vm6, 0, %v858_v1  ;;  %v1050_v1 = vsub.f32 %v297_v53, %v315_v55  ;;  %v416_v25 = vsub.f32 %v1045_v63, %v415_v16 }
  0x33   :  { %v85_v5 = vsub.s32 32, %v84_v4  ;;  %v86_v7 = vshll.u32 %v77_v61, %v84_v4  ;;  %v89_v8 = vsub.s32 4294967266, %v84_v4  ;;  %v1041_v61 = vsub.f32 %v295_v44, %v311_v46 }
  0x34   :  { %v391_v4 = vand.u32 4294901760, %v1033_v57  ;;  %v221_v44 = vand.u32 127, %v220_v42 }
  0x35   :  { %v87_v9 = vshrl.u32 %v69_v2, %v85_v5  ;;  %v90_v10 = vadd.s32 127, %v89_v8  ;;  %v1052_v2 = vsub.f32 %v299_v54, %v319_v56  ;;  %v403_v5 = vand.u32 4294901760, %v1035_v58 }
  0x36   :  { %v961_v8 = vmov 0.0   ;;  %v237_v46 = vand.u32 8, %v221_v44  ;;  %v222_v49 = vand.u32 16, %v221_v44  ;;  %v251_v51 = vand.u32 4, %v221_v44 }
  0x37   :  { %v88_v11 = vor.u32 %v87_v9, %v86_v7  ;;  %v91_v12 = vshll.u32 %v90_v10, 23  ;;  %v397_v7 = vand.u32 4294901760, %v1039_v60  ;;  %662 = vmatprep.mubr.f32.mxu0 %v961_v8  ;;  %v409_v9 = vand.u32 4294901760, %v1041_v61  ;;  %377 = vmatprep.mubr.f32.mxu1 %v961_v8 }
  0x38   :  { %v896_v10 = vpack.c.bf16 %v403_v5, %v391_v4  ;;  %v433_v24 = vand.u32 4294901760, %v1052_v2  ;;  %v886_v39 = vpack.c.bf16 %v1052_v2, %v1050_v1  ;;  %vm238_vm0 = vcmp.gt.s32.totalorder %v237_v46, 0 }
  0x39   :  { %v92_v13 = vor.u32 4788187, %v91_v12  ;;  %v95_v14 = vcvt.s32.f32 %v88_v11  ;;  %v392_v11 = vsub.f32 %v1033_v57, %v391_v4  ;;  %v404_v12 = vsub.f32 %v1035_v58, %v403_v5 }
  0x3a   :  { %897 = vmatprep.subr.bf16.mxu0 %v896_v10  ;;  %vm223_vm1 = vcmp.gt.s32.totalorder %v222_v49, 0  ;;  %v265_v53 = vand.u32 2, %v221_v44  ;;  %vm252_vm2 = vcmp.gt.s32.totalorder %v251_v51, 0 }
  0x3b   :  { %v93_v15 = vand.u32 2147483647, %v92_v13  ;;  %v398_v13 = vsub.f32 %v1039_v60, %v397_v7  ;;  %v405_v19 = vand.u32 4294901760, %v404_v12 }
  0x3c   :  { %vm266_vm3 = vcmp.gt.s32.totalorder %v265_v53, 0 }
  0x3d   :  { %v96_v17 = vmul.f32 %v95_v14, %v93_v15  ;;  %v1066_v14 = vpack.c.bf16 %v409_v9, %v397_v7  ;;  %v410_v15 = vsub.f32 %v1041_v61, %v409_v9 }
  0x3f   :  { %v97_v18 = vxor.u32 2147483648, %v96_v17  ;;  %v411_v22 = vand.u32 4294901760, %v410_v15 }
  0x41   :  { %v98_v20 = vsel %vm15_vm7, %v97_v18, %v96_v17  ;;  %v427_v17 = vand.u32 4294901760, %v1047_v0  ;;  %v393_v18 = vand.u32 4294901760, %v392_v11 }
  0x42   :  { %v101_v21 = vsel %vm14_vm8, %v980_v3, %v98_v20  ;;  %v960_v3 = vmov 4   ;;  %v399_v20 = vand.u32 4294901760, %v398_v13 }
  0x43   :  { %946 = vcosq.f32 %v101_v21  ;;  %v900_v23 = vpack.c.bf16 %v427_v17, %v415_v16 }
  0x44   :  { %948 = vsinq.f32 %v101_v21  ;;  %v421_v21 = vand.u32 4294901760, %v1050_v1 }
  0x4d   :  { %v947_v26 = vpop.eup %946 }
  0x4e   :  { %v949_v27 = vpop.eup %948  ;;  %v112_v28 = vxor.u32 2147483648, %v947_v26 }
  0x4f   :  { %v109_v29 = vxor.u32 2147483648, %v949_v27 }
  0x50   :  { %v217_v6 = vsel %vm215_vm9, %v112_v28, %v949_v27  ;;  %v113_v30 = vsel %vm111_vm10, %v112_v28, %v949_v27  ;;  %v428_v27 = vsub.f32 %v1047_v0, %v427_v17  ;;  %v422_v28 = vsub.f32 %v1050_v1, %v421_v21 }
  0x51   :  { %v214_v31 = vsel %vm212_vm11, %v947_v26, %v109_v29  ;;  %v110_v32 = vsel %vm108_vm12, %v947_v26, %v109_v29  ;;  %v872_v26 = vpack.c.bf16 %v405_v19, %v393_v18  ;;  %v874_v29 = vpack.c.bf16 %v411_v22, %v399_v20 }
  0x52   :  { %v218_v33 = vsel %vm211_vm13, %v214_v31, %v217_v6  ;;  %v114_v34 = vsel %vm107_vm14, %v110_v32, %v113_v30  ;;  %v902_v6 = vpack.c.bf16 %v433_v24, %v421_v21  ;;  %v417_v30 = vand.u32 4294901760, %v416_v25 }
  0x53   :  { %v219_v35 = vsel %vm105_vm15, nan, %v218_v33  ;;  %v115_v36 = vsel %vm105_vm15, nan, %v114_v34  ;;  %v434_v31 = vsub.f32 %v1052_v2, %v433_v24  ;;  %873 = vmatprep.subr.bf16.mxu1 %v872_v26  ;;  %v429_v32 = vand.u32 4294901760, %v428_v27 }
  0x54   :  { %242 = vperm.xlu1 %939, %v219_v35   ;;  %228 = vperm.xlu0 %938, %v219_v35   ;;  %v423_v33 = vand.u32 4294901760, %v422_v28 }
  0x55   :  { %v435_v34 = vand.u32 4294901760, %v434_v31 }
  0x58   :  { %246 = vperm.xlu1 %939, %v115_v36   ;;  %233 = vperm.xlu0 %938, %v115_v36  }
  0x5c   :  { %941 = vset.pattern.permute.xlu1 %v958_v37  ;;  %940 = vset.pattern.permute.xlu0 %v958_v37  ;;  %v880_v37 = vpack.c.bf16 %v1035_v58, %v1033_v57  ;;  %v279_v58 = vand.u32 1, %v221_v44 }
  0x5d   :  { %260 = vperm.xlu1 %941, %v115_v36   ;;  %256 = vperm.xlu0 %940, %v219_v35  }
  0x5e   :  { %vm280_vm4 = vcmp.gt.s32.totalorder %v279_v58, 0 }
  0x61   :  { %942 = vset.pattern.permute.xlu1 %v959_v38  ;;  %943 = vset.pattern.permute.xlu0 %v959_v38  ;;  %v882_v38 = vpack.c.bf16 %v1041_v61, %v1039_v60 }
  0x62   :  { %270 = vperm.xlu1 %942, %v219_v35   ;;  %274 = vperm.xlu0 %943, %v115_v36  }
  0x66   :  { %944 = vset.pattern.permute.xlu1 %v960_v3  ;;  %945 = vset.pattern.permute.xlu0 %v960_v3  ;;  %v884_v3 = vpack.c.bf16 %v1047_v0, %v1045_v63 }
  0x67   :  { %284 = vperm.xlu1 %944, %v219_v35   ;;  %v876_v35 = vpack.c.bf16 %v429_v32, %v417_v30 }
  0x6b   :  { %288 = vperm.xlu1 %944, %v115_v36   ;;  %v878_v36 = vpack.c.bf16 %v435_v34, %v423_v33 }
  0xd3   :  { %v243_v40 = vpop.permute.xlu1 %242  ;;  %v229_v41 = vpop.permute.xlu0 %228 }
  0xd7   :  { %v247_v43 = vpop.permute.xlu1 %246  ;;  %v234_v45 = vpop.permute.xlu0 %233 }
  0xd8   :  { %v249_v55 = vsel %vm238_vm0, %v243_v40, %v247_v43  ;;  %v236_v56 = vsel %vm223_vm1, %v229_v41, %v234_v45 }
  0xd9   :  { %v250_v61 = vmul.f32 %v249_v55, %v236_v56 }
  0xdc   :  { %v261_v50 = vpop.permute.xlu1 %260  ;;  %v257_v52 = vpop.permute.xlu0 %256 }
  0xdd   :  { %v263_v60 = vsel %vm252_vm2, %v257_v52, %v261_v50 }
  0xde   :  { %v264_v1 = vmul.f32 %v263_v60, %v250_v61 }
  0xe1   :  { %v271_v54 = vpop.permute.xlu1 %270  ;;  %v275_v57 = vpop.permute.xlu0 %274 }
  0xe2   :  { %v277_v0 = vsel %vm266_vm3, %v271_v54, %v275_v57 }
  0xe3   :  { %v278_v2 = vmul.f32 %v277_v0, %v264_v1 }
  0xe6   :  { %v285_v63 = vpop.permute.xlu1 %284 }
  0xea   :  { %v289_v4 = vpop.permute.xlu1 %288 }
  0xeb   :  { %v291_v5 = vsel %vm280_vm4, %v285_v63, %v289_v4 }
  0xec   :  { %v292_v7 = vmul.f32 %v291_v5, %v278_v2 }
  0xee   :  { %v303_v9 = vsel %vm301_vm5, %v292_v7, 0 }
  0xef   :  { %v378_v10 = vand.u32 4294901760, %v303_v9 }
  0xf1   :  { %v379_v11 = vsub.f32 %v303_v9, %v378_v10 }
  0xf3   :  { %v380_v12 = vand.u32 4294901760, %v379_v11 }
  0xf5   :  { %666 = vmatmul.mubr.f32.vlgmr.msra.gmra.mrb[0].mxu0 %v380_v12  ;;  %v381_v13 = vsub.f32 %v379_v11, %v380_v12 }
  0xf6   :  { %899 = vmatpush1.bf16.msra.mxu0 %v1066_v14  ;;  %760 = vmatprep.mubr.f32.mxu0 %v961_v8 }
  0xf7   :  { %v382_v15 = vand.u32 4294901760, %v381_v13  ;;  %901 = vmatprep.subr.bf16.mxu0 %v900_v23 }
  0xf9   :  { %383 = vmatmul.mubr.f32.vlgmr.msra.gmra.mrb[0].mxu1 %v382_v15 }
  0xfa   :  { %875 = vmatpush1.bf16.msra.mxu1 %v874_v29  ;;  %903 = vmatpush1.bf16.msra.mxu0 %v902_v6 }
  0xfb   :  { %877 = vmatprep.subr.bf16.mxu1 %v876_v35  ;;  %905 = vmatprep.subr.bf16.mxu0 %v1013_v47 }
  0xfc   :  { %493 = vmatprep.mubr.f32.mxu1 %v961_v8 }
  0xfd   :  { %762 = vmatmul.mubr.f32.vlgmr.msra.gmra.mrb[0].mxu0 %v378_v10 }
  0xfe   :  { %879 = vmatpush1.bf16.msra.mxu1 %v878_v36  ;;  %907 = vmatpush1.bf16.msra.mxu0 %v1015_v48 }
  0xff   :  { %881 = vmatprep.subr.bf16.mxu1 %v880_v37  ;;  %909 = vmatprep.subr.bf16.mxu0 %v1037_v59 }
 0x100   :  { %840 = vmatprep.mubr.f32.mxu0 %v961_v8 }
 0x101   :  { %495 = vmatmul.mubr.f32.vlgmr.msra.gmra.mrb[0].mxu1 %v378_v10 }
 0x102   :  { %883 = vmatpush1.bf16.msra.mxu1 %v882_v38  ;;  %911 = vmatpush1.bf16.msra.mxu0 %v1043_v62 }
 0x103   :  { %885 = vmatprep.subr.bf16.mxu1 %v884_v3  ;;  %581 = vmatprep.mubr.f32.mxu1 %v961_v8 }
 0x105   :  { %842 = vmatmul.mubr.f32.vlgmr.msra.gmra.mrb[0].mxu0 %v378_v10 }
 0x106   :  { %887 = vmatpush1.bf16.msra.mxu1 %v886_v39 }
 0x109   :  { %584 = vmatmul.mubr.f32.vlgmr.msra.gmra.mrb[0].mxu1 %v379_v11 }
 0x1d8   :  { %v843_v47 = vpop.f32.mrb[0].mxu0 }
 0x1d9   :  { %v845_v14 = vpop.f32.mrb[1].mxu0 }
 0x1dc   :  { %v585_v16 = vpop.f32.mrb[0].mxu1 }
 0x1dd   :  { %v912_v17 = vadd.f32 %v843_v47, %v585_v16  ;;  %v587_v48 = vpop.f32.mrb[1].mxu1 }
 0x1de   :  { %v913_v18 = vadd.f32 %v845_v14, %v587_v48 }
 0x1df   :  { %v848_v19 = vmul.f32 %v912_v17, %v912_v17 }
 0x1e0   :  { %v849_v59 = vmul.f32 %v913_v18, %v913_v18 }
 0x1e1   :  { %850 = vst [vmem:[%s1102_s2] sm:$0xff] %v848_v19 }
 0x1e2   :  { %851 = vst [vmem:[%s1102_s2 + $0x8] sm:$0xff] %v849_v59 }

</bundles_post_ra>
